<compile_context>
chip_gen: v7x
topology: tpu7x:2x2x1
jax: 0.10.0
libtpu: 0.0.40
codegen_flags: <defaults>
</compile_context>

<pallas_src>
import jax
import jax.numpy as jnp
from jax import lax
from jax.experimental import pallas as pl
from jax.experimental.pallas import tpu as pltpu


def _mlp_kernel(x_ref, w1_ref, b1_ref, w2_ref, b2_ref, o_ref):
    # x_ref:  (TB, F)   batch tile of the flattened input, F = seq*dim
    # w1_ref: (H, F)    fc1 weight, PyTorch (out, in) layout -- NOT transposed
    # b1_ref: (1, H)
    # w2_ref: (F, H)    fc2 weight, PyTorch (out, in) layout -- NOT transposed
    # b2_ref: (1, F)
    # o_ref:  (TB, F)
    x = x_ref[...]

    # h = x @ W1.T + b1 : contract x axis 1 against w1 axis 1 (MXU handles the
    # transposed operand natively, no data movement).
    h = lax.dot_general(
        x, w1_ref[...],
        dimension_numbers=(((1,), (1,)), ((), ())),
        preferred_element_type=jnp.float32,
    ) + b1_ref[...]
    h = jnp.maximum(h, 0.0)                       # ReLU on VPU, f32

    # y = h @ W2.T + b2 : same trick; cast h to the weight compute dtype
    # (no-op in f32, enables the bf16 path on v6e/v7x).
    y = lax.dot_general(
        h.astype(w2_ref.dtype), w2_ref[...],
        dimension_numbers=(((1,), (1,)), ((), ())),
        preferred_element_type=jnp.float32,
    ) + b2_ref[...]
    o_ref[...] = y.astype(o_ref.dtype)


def _pick_batch_tile(batch, max_tile=512):
    """Largest legal batch tile: full batch if small, else a multiple of 8
    that divides batch (the (8,128) rule applies to the second-to-last dim
    only when the block is smaller than the full extent)."""
    if batch <= max_tile:
        return batch
    for tb in range(max_tile - (max_tile % 8), 7, -8):
        if batch % tb == 0:
            return tb
    return batch  # fall back to a single block


def _vmem_bytes(tb, feat, hidden, itemsize):
    # Double-buffered x/out tiles + resident weights/biases (assume the
    # pipeline still allocates 2 buffers per operand -> be conservative).
    per_step = 2 * tb * feat + 2 * feat * hidden + hidden + feat
    return 2 * per_step * itemsize


def simple_fcnet_exchange(x, w1, b1, w2, b2, *, max_batch_tile=512,
                          compute_dtype=None):
    """x: (batch, seq, dim). w1: (H, F), b1: (H,), w2: (F, H), b2: (F,).
    compute_dtype=jnp.bfloat16 halves weight traffic on v6e/v7x (f32 accum)."""
    batch, seq, dim = x.shape
    feat = seq * dim
    hidden = w1.shape[0]
    assert w1.shape == (hidden, feat)
    assert w2.shape == (feat, hidden)

    x2d = x.reshape(batch, feat)                  # glue reshape (plain JAX)
    b1r = b1.reshape(1, hidden).astype(jnp.float32)
    b2r = b2.reshape(1, feat).astype(jnp.float32)

    if compute_dtype is not None:
        x2d = x2d.astype(compute_dtype)
        w1c = w1.astype(compute_dtype)
        w2c = w2.astype(compute_dtype)
    else:
        w1c, w2c = w1, w2

    tb = _pick_batch_tile(batch, max_batch_tile)
    grid = (batch // tb,)

    itemsize = jnp.dtype(x2d.dtype).itemsize
    needed = _vmem_bytes(tb, feat, hidden, itemsize)
    # Cap at v7x physical VMEM (64 MiB); floor well above v5e's 16 MiB default.
    vmem_limit = int(min(64 * 1024 * 1024, max(2 * needed + (4 << 20), 16 << 20)))

    flops = 2 * 2 * batch * feat * hidden                     # two matmuls
    bytes_accessed = itemsize * (2 * batch * feat + 2 * feat * hidden) + 4 * (hidden + feat)

    # TODO(synk): for production shapes with feat < 128, fold batch rows into
    # the lane axis (or pad feat to 128) so the final store is lane-dense.
    out2d = pl.pallas_call(
        _mlp_kernel,
        out_shape=jax.ShapeDtypeStruct((batch, feat), x.dtype),
        grid=grid,
        in_specs=[
            pl.BlockSpec((tb, feat), lambda i: (i, 0)),       # x: tiled on batch
            pl.BlockSpec((hidden, feat), lambda i: (0, 0)),   # w1: VMEM-resident
            pl.BlockSpec((1, hidden), lambda i: (0, 0)),      # b1: resident
            pl.BlockSpec((feat, hidden), lambda i: (0, 0)),   # w2: VMEM-resident
            pl.BlockSpec((1, feat), lambda i: (0, 0)),        # b2: resident
        ],
        out_specs=pl.BlockSpec((tb, feat), lambda i: (i, 0)),
        compiler_params=pltpu.CompilerParams(
            dimension_semantics=("parallel",),                # megacore on v7x
            vmem_limit_bytes=vmem_limit,
        ),
        cost_estimate=pl.CostEstimate(
            flops=flops, transcendentals=0, bytes_accessed=bytes_accessed),
    )(x2d, w1c, b1r, w2c, b2r)

    return out2d.reshape(batch, seq, dim)         # x.view(batch, seq, dim)


def _init_params(key, feat, hidden):
    """Deterministic init mimicking nn.Linear default (uniform +-1/sqrt(fan_in))."""
    k1, k2, k3, k4 = jax.random.split(key, 4)
    bound1 = 1.0 / jnp.sqrt(feat)
    bound2 = 1.0 / jnp.sqrt(hidden)
    w1 = jax.random.uniform(k1, (hidden, feat), jnp.float32, -bound1, bound1)
    b1 = jax.random.uniform(k2, (hidden,), jnp.float32, -bound1, bound1)
    w2 = jax.random.uniform(k3, (feat, hidden), jnp.float32, -bound2, bound2)
    b2 = jax.random.uniform(k4, (feat,), jnp.float32, -bound2, bound2)
    return w1, b1, w2, b2


if __name__ == "__main__":
    # Small shapes consistent with the module: constructor's `sequence_length`
    # must equal seq*dim of the input (32 here); hidden_dm is 256.
    batch, seq, dim = 2, 8, 4
    feat = seq * dim          # 32
    hidden = 256

    key = jax.random.PRNGKey(0)
    kx, kp = jax.random.split(key)
    x = jax.random.normal(kx, (batch, seq, dim), jnp.float32)
    w1, b1, w2, b2 = _init_params(kp, feat, hidden)

    out = simple_fcnet_exchange(x, w1, b1, w2, b2)
    out = jax.block_until_ready(out)

    # Cross-check against plain-JAX reference of the PyTorch forward.
    x2d = x.reshape(batch, feat)
    ref = (jnp.maximum(x2d @ w1.T + b1, 0.0) @ w2.T + b2).reshape(batch, seq, dim)
    assert out.shape == (batch, seq, dim)
    assert jnp.allclose(out, ref, atol=1e-5, rtol=1e-5)

    print("KERNEL_OK")
</pallas_src>

<mosaic_0001>
module attributes {stable_mosaic.version = 11 : i64} {
  func.func @_mlp_kernel(%arg0: i32, %arg1: memref<2x32xf32, #tpu.memory_space<vmem>>, %arg2: memref<256x32xf32, #tpu.memory_space<vmem>>, %arg3: memref<1x256xf32, #tpu.memory_space<vmem>>, %arg4: memref<32x256xf32, #tpu.memory_space<vmem>>, %arg5: memref<1x32xf32, #tpu.memory_space<vmem>>, %arg6: memref<2x32xf32, #tpu.memory_space<vmem>>) attributes {dimension_semantics = [#tpu.dimension_semantics<parallel>], iteration_bounds = array<i64: 1>, scalar_prefetch = 0 : i64, scratch_operands = 0 : i64, tpu.core_type = #tpu.core_type<tc>, window_params = [{transform_indices = @transform_0, window_bounds = array<i64: 2, 32>}, {pipeline_mode = #tpu.pipeline_mode<synchronous>, transform_indices = @transform_1, window_bounds = array<i64: 256, 32>}, {pipeline_mode = #tpu.pipeline_mode<synchronous>, transform_indices = @transform_2, window_bounds = array<i64: 1, 256>}, {pipeline_mode = #tpu.pipeline_mode<synchronous>, transform_indices = @transform_3, window_bounds = array<i64: 32, 256>}, {pipeline_mode = #tpu.pipeline_mode<synchronous>, transform_indices = @transform_4, window_bounds = array<i64: 1, 32>}, {transform_indices = @transform_5, window_bounds = array<i64: 2, 32>}]} {
    %c0 = arith.constant 0 : index
    %c0_0 = arith.constant 0 : index
    %0 = vector.load %arg1[%c0, %c0_0] : memref<2x32xf32, #tpu.memory_space<vmem>>, vector<2x32xf32>
    %c0_1 = arith.constant 0 : index
    %c0_2 = arith.constant 0 : index
    %1 = vector.load %arg2[%c0_1, %c0_2] : memref<256x32xf32, #tpu.memory_space<vmem>>, vector<256x32xf32>
    %cst = arith.constant dense<0.000000e+00> : vector<2x256xf32>
    %2 = tpu.matmul %0, %1, %cst {dimension_numbers = #tpu.dot_dimension_numbers<[1], [1], [0], [0], [0, 0, 1, 0], [], []>} : vector<2x32xf32>, vector<256x32xf32>, vector<2x256xf32> -> vector<2x256xf32>
    %c0_3 = arith.constant 0 : index
    %c0_4 = arith.constant 0 : index
    %3 = vector.load %arg3[%c0_3, %c0_4] : memref<1x256xf32, #tpu.memory_space<vmem>>, vector<1x256xf32>
    %4 = vector.broadcast %3 : vector<1x256xf32> to vector<2x256xf32>
    %5 = arith.addf %2, %4 : vector<2x256xf32>
    %cst_5 = arith.constant 0.000000e+00 : f32
    %6 = vector.broadcast %cst_5 : f32 to vector<2x256xf32>
    %7 = arith.maximumf %5, %6 : vector<2x256xf32>
    %c0_6 = arith.constant 0 : index
    %c0_7 = arith.constant 0 : index
    %8 = vector.load %arg4[%c0_6, %c0_7] : memref<32x256xf32, #tpu.memory_space<vmem>>, vector<32x256xf32>
    %cst_8 = arith.constant dense<0.000000e+00> : vector<2x32xf32>
    %9 = tpu.matmul %7, %8, %cst_8 {dimension_numbers = #tpu.dot_dimension_numbers<[1], [1], [0], [0], [0, 0, 1, 0], [], []>} : vector<2x256xf32>, vector<32x256xf32>, vector<2x32xf32> -> vector<2x32xf32>
    %c0_9 = arith.constant 0 : index
    %c0_10 = arith.constant 0 : index
    %10 = vector.load %arg5[%c0_9, %c0_10] : memref<1x32xf32, #tpu.memory_space<vmem>>, vector<1x32xf32>
    %11 = vector.broadcast %10 : vector<1x32xf32> to vector<2x32xf32>
    %12 = arith.addf %9, %11 : vector<2x32xf32>
    %c0_11 = arith.constant 0 : index
    %c0_12 = arith.constant 0 : index
    %13 = vector.load %arg6[%c0_11, %c0_12] : memref<2x32xf32, #tpu.memory_space<vmem>>, vector<2x32xf32>
    tpu.vector_store %arg6[%c0_11, %c0_12], %12 {strides = array<i32>} : memref<2x32xf32, #tpu.memory_space<vmem>>, vector<2x32xf32>,
    return
  }
  func.func @transform_0(%arg0: i32) -> (i32, i32) {
    %c0_i32 = arith.constant 0 : i32
    %c0_i32_0 = arith.constant 0 : i32
    return %arg0, %c0_i32 : i32, i32
  }
  func.func @transform_1(%arg0: i32) -> (i32, i32) {
    %c0_i32 = arith.constant 0 : i32
    %c0_i32_0 = arith.constant 0 : i32
    %c0_i32_1 = arith.constant 0 : i32
    return %c0_i32, %c0_i32_0 : i32, i32
  }
  func.func @transform_2(%arg0: i32) -> (i32, i32) {
    %c0_i32 = arith.constant 0 : i32
    %c0_i32_0 = arith.constant 0 : i32
    %c0_i32_1 = arith.constant 0 : i32
    return %c0_i32, %c0_i32_0 : i32, i32
  }
  func.func @transform_3(%arg0: i32) -> (i32, i32) {
    %c0_i32 = arith.constant 0 : i32
    %c0_i32_0 = arith.constant 0 : i32
    %c0_i32_1 = arith.constant 0 : i32
    return %c0_i32, %c0_i32_0 : i32, i32
  }
  func.func @transform_4(%arg0: i32) -> (i32, i32) {
    %c0_i32 = arith.constant 0 : i32
    %c0_i32_0 = arith.constant 0 : i32
    %c0_i32_1 = arith.constant 0 : i32
    return %c0_i32, %c0_i32_0 : i32, i32
  }
  func.func @transform_5(%arg0: i32) -> (i32, i32) {
    %c0_i32 = arith.constant 0 : i32
    %c0_i32_0 = arith.constant 0 : i32
    return %arg0, %c0_i32 : i32, i32
  }
}

</mosaic_0001>

<bundles_post_ra>
// kernel: tpu_custom_call.1
= control target key start
LH: loop header
LB: loop body
LE: loop exit
PB: predicated region body
PF: predicated region fallthrough
CT: control target
= control target key end

     0   :  { %vm66_vm0 = vcmask 261120   ;;  %s701_s0 = inlined_call_operand.vmem [shape: f32[2,32], index: 0, kind: input, shape index: {}]   ;;  %s702_s1 = inlined_call_operand.vmem [shape: f32[256,32], index: 1, kind: input, shape index: {}]   ;;  %s703_s2 = inlined_call_operand.vmem [shape: f32[1,256], index: 2, kind: input, shape index: {}]   ;;  %s704_s3 = inlined_call_operand.vmem [shape: f32[32,256], index: 3, kind: input, shape index: {}]   ;;  %s705_s4 = inlined_call_operand.vmem [shape: f32[1,32], index: 4, kind: input, shape index: {}]   ;;  %s706_s5 = inlined_call_operand.hbm [shape: f32[2,32], index: 5, kind: output, shape index: {}]  }
   0x1   :  { %v38_v0 = vld [vmem:[%s702_s1 + $0x80] sm:$0xff]  ;;  %v39_v1 = vld [vmem:[%s702_s1 + $0x88] sm:$0xff]  ;;  %vm531_vm1 = vmpackc.low %vm66_vm0, %vm66_vm0 }
   0x2   :  { %v22_v2 = vld [vmem:[%s702_s1] sm:$0xff]  ;;  %v408_v3 = vpack.c.bf16 %v39_v1, %v38_v0  ;;  %v23_v5 = vld [vmem:[%s702_s1 + $0x8] sm:$0xff]  ;;  %v40_v6 = vld [vmem:[%s702_s1 + $0x90] sm:$0xff] }
   0x3   :  { %v411_v7 = vpack.c.bf16 %v23_v5, %v22_v2  ;;  %v41_v8 = vld [vmem:[%s702_s1 + $0x98] sm:$0xff]  ;;  %v24_v10 = vld [vmem:[%s702_s1 + $0x10] sm:$0xff]  ;;  %v42_v12 = vld [vmem:[%s702_s1 + $0xa0] sm:$0xff] }
   0x4   :  { %410 = vmatprep.subr.msk.bf16.mxu0 %vm531_vm1, %v408_v3  ;;  %v414_v9 = vpack.c.bf16 %v41_v8, %v40_v6  ;;  %v25_v11 = vld [vmem:[%s702_s1 + $0x18] sm:$0xff]  ;;  %v43_v13 = vld [vmem:[%s702_s1 + $0xa8] sm:$0xff]  ;;  %v26_v16 = vld [vmem:[%s702_s1 + $0x20] sm:$0xff] }
   0x5   :  { %413 = vmatpush3.bf16.xpose.msk.msra.mxu0 %vm531_vm1, %v411_v7  ;;  %v417_v14 = vpack.c.bf16 %v25_v11, %v24_v10  ;;  %v420_v15 = vpack.c.bf16 %v43_v13, %v42_v12  ;;  %v21_v17 = vld [vmem:[%s701_s0] sm:$0x3]  ;;  %v240_v18 = vld [vmem:[%s704_s3 + $0x8] sm:$0xff]  ;;  %v242_v19 = vld [vmem:[%s704_s3 + $0x18] sm:$0xff] }
   0x6   :  { %416 = vmatprep.subr.msk.bf16.mxu0 %vm531_vm1, %v414_v9  ;;  %406 = vmatprep.mubr.msk.f32.mxu0 %vm66_vm0, %v21_v17  ;;  %v456_v20 = vpack.c.bf16 %v242_v19, %v240_v18  ;;  %v239_v21 = vld [vmem:[%s704_s3] sm:$0xff]  ;;  %v241_v22 = vld [vmem:[%s704_s3 + $0x10] sm:$0xff]  ;;  %v244_v23 = vld [vmem:[%s704_s3 + $0x28] sm:$0xff] }
   0x7   :  { %v27_v24 = vld [vmem:[%s702_s1 + $0x28] sm:$0xff]  ;;  %v458_v25 = vpack.c.bf16 %v241_v22, %v239_v21  ;;  %v246_v26 = vld [vmem:[%s704_s3 + $0x38] sm:$0xff] }
   0xd   :  { %419 = vmatpush3.bf16.xpose.msk.msra.mxu0 %vm531_vm1, %v417_v14 }
   0xe   :  { %422 = vmatprep.subr.msk.bf16.mxu0 %vm531_vm1, %v420_v15 }
   0xf   :  { %10 = vsyncpa [#allocation3], 0  ;;  %v44_v27 = vld [vmem:[%s702_s1 + $0xb0] sm:$0xff]  ;;  %v45_v28 = vld [vmem:[%s702_s1 + $0xb8] sm:$0xff]  ;;  %457 = vmatprep.subr.bf16.mxu1 %v456_v20  ;;  %v460_v29 = vpack.c.bf16 %v246_v26, %v244_v23  ;;  %v423_v30 = vpack.c.bf16 %v27_v24, %v26_v16  ;;  %v56_v62 = vlaneseq  ;;  %s489_s24 = smov [#allocation2]   ;;  %vm324_vm2 = vcmask 254976  }
  0x10   :  { %459 = vmatpush1.bf16.xpose.msra.mxu1 %v458_v25  ;;  %v426_v31 = vpack.c.bf16 %v45_v28, %v44_v27  ;;  %v28_v32 = vld [vmem:[%s702_s1 + $0x30] sm:$0xff]  ;;  %v29_v33 = vld [vmem:[%s702_s1 + $0x38] sm:$0xff]  ;;  %v46_v34 = vld [vmem:[%s702_s1 + $0xc0] sm:$0xff]  ;;  %s332_s25 = sshll.u32 %s489_s24, 4  ;;  %s333_s25 = int_to_ptr.vmem [resolvable:$true] %s332_s25 }
  0x11   :  { %461 = vmatprep.subr.bf16.mxu1 %v460_v29  ;;  %v47_v35 = vld [vmem:[%s702_s1 + $0xc8] sm:$0xff]  ;;  %v429_v36 = vpack.c.bf16 %v29_v33, %v28_v32  ;;  %v30_v38 = vld [vmem:[%s702_s1 + $0x40] sm:$0xff]  ;;  %v48_v40 = vld [vmem:[%s702_s1 + $0xd0] sm:$0xff]  ;;  %v57_v63 = vshrl.u32 %v56_v62, 7  ;;  %p470_p1 = scmp.lt.s32.totalorder %s333_s25, %s333_s25 }
  0x12   :  { %v432_v37 = vpack.c.bf16 %v47_v35, %v46_v34  ;;  %v31_v39 = vld [vmem:[%s702_s1 + $0x48] sm:$0xff]  ;;  %v49_v41 = vld [vmem:[%s702_s1 + $0xd8] sm:$0xff]  ;;  %v32_v44 = vld [vmem:[%s702_s1 + $0x50] sm:$0xff] }
  0x13   :  { %v435_v42 = vpack.c.bf16 %v31_v39, %v30_v38  ;;  %v438_v43 = vpack.c.bf16 %v49_v41, %v48_v40  ;;  %v33_v45 = vld [vmem:[%s702_s1 + $0x58] sm:$0xff]  ;;  %v50_v46 = vld [vmem:[%s702_s1 + $0xe0] sm:$0xff]  ;;  %v51_v47 = vld [vmem:[%s702_s1 + $0xe8] sm:$0xff]  ;;  %v58_v0 = vsub.s32 0, %v57_v63  ;;  %v62_v2 = vsub.s32 1, %v57_v63 }
  0x14   :  { %v441_v48 = vpack.c.bf16 %v33_v45, %v32_v44  ;;  %v444_v49 = vpack.c.bf16 %v51_v47, %v50_v46  ;;  %v34_v50 = vld [vmem:[%s702_s1 + $0x60] sm:$0xff]  ;;  %v35_v51 = vld [vmem:[%s702_s1 + $0x68] sm:$0xff]  ;;  %v52_v52 = vld [vmem:[%s702_s1 + $0xf0] sm:$0xff] }
  0x15   :  { %425 = vmatpush3.bf16.xpose.msk.msra.mxu0 %vm531_vm1, %v423_v30  ;;  %v53_v53 = vld [vmem:[%s702_s1 + $0xf8] sm:$0xff]  ;;  %v447_v54 = vpack.c.bf16 %v35_v51, %v34_v50  ;;  %v36_v56 = vld [vmem:[%s702_s1 + $0x70] sm:$0xff]  ;;  %v243_v59 = vld [vmem:[%s704_s3 + $0x20] sm:$0xff] }
  0x16   :  { %428 = vmatprep.subr.msk.bf16.mxu0 %vm531_vm1, %v426_v31  ;;  %v450_v55 = vpack.c.bf16 %v53_v53, %v52_v52  ;;  %v37_v57 = vld [vmem:[%s702_s1 + $0x78] sm:$0xff]  ;;  %v245_v60 = vld [vmem:[%s704_s3 + $0x30] sm:$0xff]  ;;  %v54_v1 = vld [vmem:[%s703_s2] sm:$0x3]  ;;  %s465_s2 = scalar_lea.vmem %s333_s25, 32 }
  0x17   :  { %v453_v58 = vpack.c.bf16 %v37_v57, %v36_v56  ;;  %v462_v61 = vpack.c.bf16 %v245_v60, %v243_v59  ;;  %v59_v3 = vrot.slane %v54_v1, %v58_v0  ;;  %v63_v4 = vrot.slane %v54_v1, %v62_v2  ;;  %v373_v11 = vld [vmem:[%s705_s4] ss:$0 sm:$0xff]  ;;  %p466_p0 = scmp.ne.s32.totalorder %s333_s25, %s465_s2  ;;  %p471_p2 = scmp.lt.s32.totalorder %s465_s2, %s465_s2 }
  0x19   :  { %463 = vmatpush1.bf16.xpose.msra.mxu1 %v462_v61  ;;  %p472_p3 = por %p471_p2, %p470_p1 }
  0x1b   :  { %p473_p4 = pnand %p472_p3, %p466_p0 }
  0x1d   :  { %431 = vmatpush3.bf16.xpose.msk.msra.mxu0 %vm531_vm1, %v429_v36 }
  0x1e   :  { %434 = vmatprep.subr.msk.bf16.mxu0 %vm531_vm1, %v432_v37 }
  0x25   :  { %437 = vmatpush3.bf16.xpose.msk.msra.mxu0 %vm531_vm1, %v435_v42 }
  0x26   :  { %440 = vmatprep.subr.msk.bf16.mxu0 %vm531_vm1, %v438_v43 }
  0x2d   :  { %443 = vmatpush3.bf16.xpose.msk.msra.mxu0 %vm531_vm1, %v441_v48 }
  0x2e   :  { %446 = vmatprep.subr.msk.bf16.mxu0 %vm531_vm1, %v444_v49 }
  0x35   :  { %449 = vmatpush3.bf16.xpose.msk.msra.mxu0 %vm531_vm1, %v447_v54 }
  0x36   :  { %452 = vmatprep.subr.msk.bf16.mxu0 %vm531_vm1, %v450_v55 }
  0x3d   :  { %455 = vmatpush3.bf16.xpose.msk.msra.mxu0 %vm531_vm1, %v453_v58 }
  0x44   :  { %407 = vmatmul.mubr.msk.f32.vlgmr.msra.gmra.mrb[0].mxu0 %vm66_vm0, %v21_v17 }
 0x117   :  { %v232_v5 = vpop.f32.mrb[0].mxu0 }
 0x118   :  { %v233_v6 = vadd.f32 %v232_v5, %v59_v3  ;;  %v234_v7 = vpop.f32.mrb[1].mxu0 }
 0x119   :  { %v235_v8 = vadd.f32 %v234_v7, %v63_v4 }
 0x11a   :  { %v237_v10 = vmax.f32 %v233_v6, 0.0 }
 0x11b   :  { %v238_v9 = vmax.f32 %v235_v8, 0.0 }
 0x11d   :  { %318 = vmatprep.mubr.f32.mxu1 %v238_v9 }
 0x11e   :  { %319 = vmatmul.mubr.f32.vlgmr.msra.gmra.mrb[0].mxu1 %v237_v10 }
 0x1f1   :  { %v320_v12 = vpop.f32.mrb[0].mxu1 }
 0x1f2   :  { %v321_v13 = vadd.f32 %v373_v11, %v320_v12  ;;  %v322_v14 = vpop.f32.mrb[1].mxu1 }
 0x1f4   :  { %325 = vst.msk [vmem:[#allocation2] sm:$0x3] %vm324_vm2, %v321_v13 }
 0x1f5   :  { %476 = shalt.err (!%p473_p4)
}
 0x1f6   :  { %s477_s28 = scalar_lea.hbm %s706_s5, 32 }
 0x1f7   :  { %p478_p5 = scmp.ne.s32.totalorder %s706_s5, %s477_s28  ;;  %p481_p6 = scmp.lt.u32.totalorder %s477_s28, %s706_s5 }
 0x1f9   :  { %p483_p7 = pnand %p481_p6, %p478_p5 }
 0x1fb   :  { %486 = shalt.err (!%p483_p7)
}
 0x1fc   :  { %335 = dma.vmem_to_hbm [thread:$0]  %s333_s25, 32, %s706_s5, [#allocation3]  }
 0x1fd   :  { %487 = dma.done.wait [#allocation3], 32  }
 0x1fe   :  { %488 = vsyncadd [#allocation3], 4294967264 }
 0x1ff   :  { %339 = vsyncpa [#allocation3], 1 }

</bundles_post_ra>
